<compile_context>
chip_gen: v6e
topology: v6e:2x2x1
jax: 0.10.0
libtpu: 0.0.40
codegen_flags: <defaults>
</compile_context>

<pallas_src>
import functools

import jax
import jax.numpy as jnp
from jax.experimental import pallas as pl
from jax.experimental.pallas import tpu as pltpu

MAX_LENGTH = 6
H_DIM = 18

# Per-output-buffer block cap (~85% of HBM write roofline is reached by
# ~1-2 MiB blocks; larger blocks only consume VMEM, which matters most on
# v7x's 64 MiB VMEM).  Double-buffered total stays a few MiB on every gen.
_MAX_BLOCK_BYTES = 1536 * 1024
# Do not split the grid at all unless the total output is at least this big:
# each extra grid step costs ~0.35 us and only pays off (v7x 2-TC sharding /
# DMA overlap) when every step writes 100s of KiB.
_MIN_SPLIT_BYTES = 512 * 1024


def _pos_enc_kernel(emb_ref, o_ref, *, seq_length):
    # emb_ref: (MAX_LENGTH, H_DIM) VMEM tile, full table.  Constant index_map
    #          => resident across grid steps, never re-fetched.
    # o_ref:   (TB, seq_length, H_DIM) output slab for this grid step.
    # Every batch row's positions are [0..seq_length-1], so the embedding
    # lookup is a static contiguous row-slice broadcast over the batch dim.
    # One hoisted broadcast + one store; Mosaic strip-mines it over the block.
    o_ref[...] = jnp.broadcast_to(emb_ref[:seq_length, :], o_ref.shape)


def _choose_batch_tile(B, S, h_dim, dtype_bytes=4):
    """Batch rows per grid step (TB).

    * Output smaller than _MIN_SPLIT_BYTES: single grid step covering the
      whole output (splitting is pure per-step overhead on 1-TC v5e/v6e and
      not worth a 2nd output DMA on v7x for sub-100s-of-KiB slabs).
    * Otherwise: largest TB whose (TB, S, h_dim) f32 block stays under
      _MAX_BLOCK_BYTES — saturates HBM write BW while keeping the
      double-buffered VMEM footprint small on every TPU generation.
    """
    row_bytes = S * h_dim * dtype_bytes
    out_bytes = B * row_bytes
    if out_bytes < _MIN_SPLIT_BYTES:
        return B
    return max(1, min(B, _MAX_BLOCK_BYTES // row_bytes))


def positional_encoding(x, emb_table, *, _force_tb=None):
    """x: (B, S) int token ids (values unused; only the shape matters, exactly
    as in the PyTorch forward).  emb_table: (MAX_LENGTH, H_DIM) float32.
    Returns (B, S, H_DIM) float32 == emb_table[arange(S)] broadcast over B."""
    B, S = x.shape
    assert S <= MAX_LENGTH, "seq_length must not exceed max_length"

    TB = _force_tb if _force_tb is not None else _choose_batch_tile(B, S, H_DIM)
    num_steps = pl.cdiv(B, TB)

    kernel = functools.partial(_pos_enc_kernel, seq_length=S)
    cost = pl.CostEstimate(
        flops=0,
        transcendentals=0,
        bytes_accessed=B * S * H_DIM * 4 + MAX_LENGTH * H_DIM * 4,
    )
    return pl.pallas_call(
        kernel,
        out_shape=jax.ShapeDtypeStruct((B, S, H_DIM), emb_table.dtype),
        grid=(num_steps,),
        # Full-table block (block shape == array shape, so the (8,128) rule is
        # satisfied); constant index_map => stays resident, no per-step DMA.
        in_specs=[pl.BlockSpec((MAX_LENGTH, H_DIM), lambda b: (0, 0))],
        # One (TB, S, H_DIM) output slab per grid step: last two block dims
        # equal the full array dims.  A partial boundary block (B % TB != 0)
        # is handled by Pallas' masked writeback (exercised in the self-test).
        out_specs=pl.BlockSpec((TB, S, H_DIM), lambda b: (b, 0, 0)),
        compiler_params=pltpu.CompilerParams(
            # Only meaningful when num_steps > 1 on v7x (2 TensorCores);
            # measured no-op on single-TC v5e/v6e, harmless to keep.
            dimension_semantics=("parallel",),
        ),
        cost_estimate=cost,
    )(emb_table)


if __name__ == "__main__":
    key = jax.random.PRNGKey(0)
    k_emb, k_x = jax.random.split(key)

    # Deterministic parameter init: nn.Embedding default is N(0, 1).
    emb_table = jax.random.normal(k_emb, (MAX_LENGTH, H_DIM), dtype=jnp.float32)

    # Small input consistent with the forward: (batch=2, seq=4) token ids.
    B, S = 2, 4
    x = jax.random.randint(k_x, (B, S), 0, MAX_LENGTH, dtype=jnp.int32)

    out = jax.block_until_ready(positional_encoding(x, emb_table))

    # Reference: positions = arange(S) broadcast over batch, then lookup.
    ref = jnp.broadcast_to(emb_table[:S][None, :, :], (B, S, H_DIM))
    assert out.shape == (B, S, H_DIM)
    assert out.dtype == jnp.float32
    assert jnp.allclose(out, ref), "mismatch vs reference"

    # Ragged multi-step path (B % TB != 0): exercises the partial last output
    # block's masked writeback flagged in the review.  Forced here because the
    # size-gated heuristic correctly picks a single grid step at these sizes.
    B2 = 3
    x2 = jax.random.randint(k_x, (B2, S), 0, MAX_LENGTH, dtype=jnp.int32)
    out2 = jax.block_until_ready(positional_encoding(x2, emb_table, _force_tb=2))
    ref2 = jnp.broadcast_to(emb_table[:S][None, :, :], (B2, S, H_DIM))
    assert jnp.allclose(out2, ref2), "mismatch vs reference (ragged grid)"

    print("KERNEL_OK")
</pallas_src>

<mosaic_0001>
module attributes {stable_mosaic.version = 11 : i64} {
  func.func @_pos_enc_kernel(%arg0: i32, %arg1: memref<6x18xf32, #tpu.memory_space<vmem>>, %arg2: memref<2x4x18xf32, #tpu.memory_space<vmem>>) attributes {dimension_semantics = [#tpu.dimension_semantics<parallel>], iteration_bounds = array<i64: 1>, scalar_prefetch = 0 : i64, scratch_operands = 0 : i64, tpu.core_type = #tpu.core_type<tc>, window_params = [{pipeline_mode = #tpu.pipeline_mode<synchronous>, transform_indices = @transform_0, window_bounds = array<i64: 6, 18>}, {transform_indices = @transform_1, window_bounds = array<i64: 2, 4, 18>}]} {
    %c0 = arith.constant 0 : index
    %c0_0 = arith.constant 0 : index
    %0 = vector.load %arg1[%c0, %c0_0] : memref<6x18xf32, #tpu.memory_space<vmem>>, vector<4x18xf32>
    %1 = vector.shape_cast %0 : vector<4x18xf32> to vector<1x4x18xf32>
    %2 = vector.broadcast %1 : vector<1x4x18xf32> to vector<2x4x18xf32>
    %c0_1 = arith.constant 0 : index
    %c0_2 = arith.constant 0 : index
    %c0_3 = arith.constant 0 : index
    %3 = vector.load %arg2[%c0_1, %c0_2, %c0_3] : memref<2x4x18xf32, #tpu.memory_space<vmem>>, vector<2x4x18xf32>
    tpu.vector_store %arg2[%c0_1, %c0_2, %c0_3], %2 {strides = array<i32>} : memref<2x4x18xf32, #tpu.memory_space<vmem>>, vector<2x4x18xf32>,
    return
  }
  func.func @transform_0(%arg0: i32) -> (i32, i32) {
    %c0_i32 = arith.constant 0 : i32
    %c0_i32_0 = arith.constant 0 : i32
    %c0_i32_1 = arith.constant 0 : i32
    return %c0_i32, %c0_i32_0 : i32, i32
  }
  func.func @transform_1(%arg0: i32) -> (i32, i32, i32) {
    %c0_i32 = arith.constant 0 : i32
    %c0_i32_0 = arith.constant 0 : i32
    %c0_i32_1 = arith.constant 0 : i32
    return %arg0, %c0_i32, %c0_i32_0 : i32, i32, i32
  }
}

</mosaic_0001>

<bundles_post_ra>
// kernel: tpu_custom_call.1
= control target key start
LH: loop header
LB: loop body
LE: loop exit
PB: predicated region body
PF: predicated region fallthrough
CT: control target
= control target key end

     0   :  { %6 = vsyncpa [#allocation3], 0  ;;  %s110_s0 = inlined_call_operand.hbm [shape: f32[6,18], index: 0, kind: input, shape index: {}]   ;;  %s111_s1 = inlined_call_operand.hbm [shape: f32[2,4,18], index: 1, kind: output, shape index: {}]  }
   0x1   :  { %7 = vsyncpa [#allocation4], 0  ;;  %s90_s6 = smov [#allocation2]  }
   0x2   :  { %s14_s7 = sshll.u32 %s90_s6, 4  ;;  %s15_s7 = int_to_ptr.vmem [resolvable:$true] %s14_s7 }
   0x3   :  { %s54_s8 = scalar_lea.vmem %s15_s7, 128  ;;  %p59_p1 = scmp.lt.s32.totalorder %s15_s7, %s15_s7 }
   0x4   :  { %p55_p0 = scmp.ne.s32.totalorder %s15_s7, %s54_s8  ;;  %p60_p2 = scmp.lt.s32.totalorder %s54_s8, %s54_s8 }
   0x6   :  { %p61_p3 = por %p60_p2, %p59_p1 }
   0x8   :  { %p62_p4 = pnand %p61_p3, %p55_p0 }
   0xa   :  { %65 = shalt.err (!%p62_p4)
}
   0xb   :  { %17 = dma.hbm_to_vmem [thread:$0]  %s110_s0, 128, %s15_s7, [#allocation3]  }
   0xc   :  { %86 = dma.done.wait [#allocation3], 128  }
   0xd   :  { %87 = vsyncadd [#allocation3], 4294967168  ;;  %s91_s11 = smov [#allocation5]   ;;  %vm22_vm0 = vcmask 142336   ;;  %v21_v0 = vld [vmem:[#allocation2] sm:$0xf] }
   0xe   :  { %s30_s12 = sshll.u32 %s91_s11, 4  ;;  %23 = vst.msk [vmem:[#allocation5] sm:$0xf] %vm22_vm0, %v21_v0  ;;  %24 = vst.msk [vmem:[#allocation5 + $0x4] sm:$0xf] %vm22_vm0, %v21_v0  ;;  %s31_s12 = int_to_ptr.vmem [resolvable:$true] %s30_s12 }
   0xf   :  { %s66_s13 = scalar_lea.vmem %s31_s12, 128  ;;  %p71_p6 = scmp.lt.s32.totalorder %s31_s12, %s31_s12 }
  0x10   :  { %p67_p5 = scmp.ne.s32.totalorder %s31_s12, %s66_s13  ;;  %p72_p7 = scmp.lt.s32.totalorder %s66_s13, %s66_s13 }
  0x12   :  { %p73_p8 = por %p72_p7, %p71_p6 }
  0x14   :  { %p74_p9 = pnand %p73_p8, %p67_p5 }
  0x16   :  { %77 = shalt.err (!%p74_p9)
}
  0x17   :  { %s92_s14 = smov 64   ;;  %s93_s15 = smov 4  }
  0x18   :  { %36 = dma.vmem_to_hbm [thread:$0]  %s31_s12, 128, %s111_s1, [#allocation4], %s92_s14, %s92_s14, %s93_s15  }
  0x19   :  { %88 = dma.done.wait [#allocation4], 128  }
  0x1a   :  { %89 = vsyncadd [#allocation4], 4294967168 }
  0x1b   :  { %40 = vsyncpa [#allocation3], 1 }
  0x1c   :  { %41 = vsyncpa [#allocation4], 1 }

</bundles_post_ra>
